<compile_context>
chip_gen: v7x
topology: tpu7x:2x2x1
jax: 0.10.0
libtpu: 0.0.40
codegen_flags: <defaults>
</compile_context>

<pallas_src>
import functools

import jax
import jax.numpy as jnp
from jax import lax
from jax.experimental import pallas as pl
from jax.experimental.pallas import tpu as pltpu


def _round_up(x, m):
    return ((x + m - 1) // m) * m


# ---------------------------------------------------------------------------
# Kernel A: fused QKV projection.
#   qkv[i, j] block = x[i] @ w_qkv[:, j]   (W_query pre-scaled by 1/sqrt(d_out))
# ---------------------------------------------------------------------------
def _qkv_proj_kernel(x_ref, w_ref, qkv_ref):
    qkv_ref[...] = jnp.dot(
        x_ref[...], w_ref[...], preferred_element_type=jnp.float32
    ).astype(qkv_ref.dtype)


# ---------------------------------------------------------------------------
# Kernel B: flash-style attention with online softmax.
#   grid = (n_q_tiles, n_kv_tiles); kv is the reduction axis (last, arbitrary).
#   Q / K / V are column blocks 0 / 1 / 2 of the fused (seq_p, 3*d_out_p) array.
# ---------------------------------------------------------------------------
def _flash_attn_kernel(q_ref, k_ref, v_ref, o_ref, m_sc, l_sc, acc_sc,
                       *, seq, tk, mask_keys):
    kv = pl.program_id(1)

    @pl.when(kv == 0)
    def _():
        m_sc[...] = jnp.full_like(m_sc, -jnp.inf)
        l_sc[...] = jnp.zeros_like(l_sc)
        acc_sc[...] = jnp.zeros_like(acc_sc)

    q = q_ref[...]                       # (tq, d_out_p); scale already folded in
    k = k_ref[...]                       # (tk, d_out_p)
    # scores = q @ k^T without materializing a transpose: contract last dims.
    s = lax.dot_general(q, k, dimension_numbers=(((1,), (1,)), ((), ())),
                        preferred_element_type=jnp.float32)      # (tq, tk)

    if mask_keys:
        # Only the LAST kv block contains padded keys (padding < tk by
        # construction): predicate the mask so the hot kv iterations skip the
        # iota/compare/select entirely.
        def _mask(sb):
            key_pos = kv * tk + lax.broadcasted_iota(jnp.int32, sb.shape, 1)
            return jnp.where(key_pos < seq, sb, -1e30)
        s = lax.cond(kv == pl.num_programs(1) - 1, _mask, lambda sb: sb, s)

    # Online softmax.  m/l scratch are lane-dense (tq, 128): every lane holds
    # the per-row value, so loads/stores are full unmasked vregs.
    m_prev = m_sc[...]                                           # (tq, 128)
    l_prev = l_sc[...]                                           # (tq, 128)
    m_curr = jnp.max(s, axis=-1, keepdims=True)                  # (tq, 1)
    m_next = jnp.maximum(m_prev, m_curr)                         # (tq, 128)
    alpha = jnp.exp(m_prev - m_next)                             # (tq, 128)
    p = jnp.exp(s - m_next[:, :1])                               # (tq, tk)
    l_sc[...] = alpha * l_prev + jnp.sum(p, axis=-1, keepdims=True)
    acc_sc[...] = acc_sc[...] * alpha[:, :1] + jnp.dot(
        p.astype(v_ref.dtype), v_ref[...], preferred_element_type=jnp.float32)
    m_sc[...] = m_next

    @pl.when(kv == pl.num_programs(1) - 1)
    def _():
        # Exact divide (NOT the approximate reciprocal) -> matches the f32
        # reference; runs once per q tile, so it is off the hot path.
        l_full = l_sc[...]
        o_ref[...] = (acc_sc[...] / l_full[:, :1]).astype(o_ref.dtype)


# ---------------------------------------------------------------------------
# Wrapper: pad to lane-dense shapes, run the two kernels, slice the result.
# ---------------------------------------------------------------------------
def self_attention_v1(x, w_query, w_key, w_value, *, qkv_dtype=None):
    """Pallas forward pass equivalent to SelfAttentionV1.forward.

    x:                    (seq, d_in)
    w_query/w_key/w_value:(d_in, d_out)
    qkv_dtype: optional dtype for the Q/K/V intermediates (e.g. jnp.bfloat16
               runs both attention matmuls at full MXU rate; accumulation
               stays f32).  Defaults to x.dtype (exact).
    returns:  (seq, d_out)
    """
    seq, d_in = x.shape
    d_out = w_query.shape[1]
    in_dtype = x.dtype
    qkv_dtype = in_dtype if qkv_dtype is None else qkv_dtype

    d_in_p = _round_up(d_in, 128)
    d_out_p = _round_up(d_out, 128)

    # ---- sequence tiling ---------------------------------------------------
    # tq (query tile) and tk (kv tile) are decoupled: big kv tiles amortize the
    # per-grid-step overhead and the online-softmax epilogue over more MXU
    # work; big q tiles cut the number of K/V re-reads from HBM.  tq always
    # divides tk, so one padded sequence length serves both grid axes.
    seq8 = _round_up(seq, 8)
    if seq8 <= 256:
        tq = tk = seq8
    else:
        tq = 256
        tk = 512 if seq8 >= 512 else 256
    seq_p = _round_up(seq, tk)
    mask_keys = seq_p != seq

    # Kernel A row tile: as large as possible (up to 512) -> fewer grid steps
    # and larger, more HBM-friendly writeback DMAs.
    if seq_p % 512 == 0:
        tile_a = 512
    elif seq_p % 256 == 0:
        tile_a = 256
    else:
        tile_a = seq_p

    scale = 1.0 / (float(d_out) ** 0.5)

    # ---- padded inputs / fused QKV weight ----------------------------------
    # 1/sqrt(d_out) is folded into W_query here (free, once, outside the
    # kernels).  Zero padding is exact: padded Q/K columns contribute 0 to the
    # scores, padded V columns stay 0 and are sliced off at the end.
    x_p = jnp.zeros((seq_p, d_in_p), in_dtype).at[:seq, :d_in].set(x)
    w_qkv = jnp.zeros((d_in_p, 3 * d_out_p), in_dtype)
    w_qkv = w_qkv.at[:d_in, 0 * d_out_p:0 * d_out_p + d_out].set(
        (w_query * scale).astype(in_dtype))
    w_qkv = w_qkv.at[:d_in, 1 * d_out_p:1 * d_out_p + d_out].set(
        w_key.astype(in_dtype))
    w_qkv = w_qkv.at[:d_in, 2 * d_out_p:2 * d_out_p + d_out].set(
        w_value.astype(in_dtype))

    # Keep the whole fused weight resident (one wide MXU matmul) while its
    # double-buffered footprint is small; otherwise tile its N axis so the
    # per-step weight block is only (d_in_p, d_out_p) -- keeps Kernel A inside
    # v7x's 64 MiB VMEM (and modest scoped limits) at any model size.
    itemsize = jnp.dtype(in_dtype).itemsize
    if 2 * d_in_p * 3 * d_out_p * itemsize <= 24 * 1024 * 1024:
        tn = 3 * d_out_p
    else:
        tn = d_out_p
    n_col = (3 * d_out_p) // tn
    n_row = seq_p // tile_a

    # ---- Kernel A: fused QKV projection ------------------------------------
    qkv = pl.pallas_call(
        _qkv_proj_kernel,
        out_shape=jax.ShapeDtypeStruct((seq_p, 3 * d_out_p), qkv_dtype),
        # Weight-column axis OUTER: each weight block is DMA'd exactly once
        # and stays resident while the row tiles stream past it.
        grid=(n_col, n_row),
        in_specs=[
            pl.BlockSpec((tile_a, d_in_p), lambda j, i: (i, 0)),   # x rows
            pl.BlockSpec((d_in_p, tn), lambda j, i: (0, j)),       # weight cols
        ],
        out_specs=pl.BlockSpec((tile_a, tn), lambda j, i: (i, j)),
        compiler_params=pltpu.CompilerParams(
            dimension_semantics=("parallel", "parallel"),
            vmem_limit_bytes=64 * 1024 * 1024),  # v5e default scoped is 16 MiB
    )(x_p, w_qkv)

    # ---- Kernel B: flash attention ------------------------------------------
    n_q = seq_p // tq
    n_kv = seq_p // tk

    out_p = pl.pallas_call(
        functools.partial(_flash_attn_kernel,
                          seq=seq, tk=tk, mask_keys=mask_keys),
        out_shape=jax.ShapeDtypeStruct((seq_p, d_out_p), in_dtype),
        grid=(n_q, n_kv),
        in_specs=[
            # Q / K / V are column blocks 0 / 1 / 2 of the fused qkv array.
            pl.BlockSpec((tq, d_out_p), lambda qi, kv: (qi, 0)),
            pl.BlockSpec((tk, d_out_p), lambda qi, kv: (kv, 1)),
            pl.BlockSpec((tk, d_out_p), lambda qi, kv: (kv, 2)),
            # NOTE: with tk=512 the per-step compute hides the K/V DMA behind
            # default double-buffering; deeper pipelining (pl.Buffered(3)) is
            # only worth it for small tiles on v6e.
        ],
        out_specs=pl.BlockSpec((tq, d_out_p), lambda qi, kv: (qi, 0)),
        scratch_shapes=[
            pltpu.VMEM((tq, 128), jnp.float32),      # running max m (lane-dense)
            pltpu.VMEM((tq, 128), jnp.float32),      # running denom l (lane-dense)
            pltpu.VMEM((tq, d_out_p), jnp.float32),  # f32 accumulator
        ],
        compiler_params=pltpu.CompilerParams(
            # q axis parallel (megacore / both v7x TCs), kv reduction last.
            dimension_semantics=("parallel", "arbitrary"),
            vmem_limit_bytes=64 * 1024 * 1024),
    )(qkv, qkv, qkv)

    return out_p[:seq, :d_out]


def _reference(x, wq, wk, wv):
    # Pure-JAX reference mirroring the PyTorch forward exactly.
    keys = x @ wk
    queries = x @ wq
    values = x @ wv
    scores = queries @ keys.T
    weights = jax.nn.softmax(scores / (keys.shape[-1] ** 0.5), axis=-1)
    return weights @ values


if __name__ == "__main__":
    root = jax.random.PRNGKey(0)

    def _check(seq, d_in, d_out, subkey):
        kx, kq, kk, kv = jax.random.split(subkey, 4)
        x = jax.random.normal(kx, (seq, d_in), dtype=jnp.float32)
        # torch.rand -> uniform [0, 1)
        wq = jax.random.uniform(kq, (d_in, d_out), dtype=jnp.float32)
        wk = jax.random.uniform(kk, (d_in, d_out), dtype=jnp.float32)
        wv = jax.random.uniform(kv, (d_in, d_out), dtype=jnp.float32)

        out = jax.block_until_ready(self_attention_v1(x, wq, wk, wv))
        ref = _reference(x, wq, wk, wv)
        assert out.shape == (seq, d_out)
        err = float(jnp.max(jnp.abs(out - ref)))
        assert jnp.allclose(out, ref, atol=1e-3, rtol=1e-3), (
            f"mismatch vs reference (seq={seq}, d_in={d_in}, d_out={d_out}), "
            f"max_abs_err={err}")

    k0, k1, k2 = jax.random.split(root, 3)
    # Primary small case consistent with the module.
    _check(seq=8, d_in=32, d_out=32, subkey=k0)
    # Multi-q-tile case (exercises accumulator reset across q tiles).
    _check(seq=512, d_in=32, d_out=32, subkey=k1)
    # Ragged case (exercises d_in/d_out padding and the predicated key mask).
    _check(seq=50, d_in=16, d_out=24, subkey=k2)

    print("KERNEL_OK")
</pallas_src>

<mosaic_0001>
module attributes {stable_mosaic.version = 11 : i64} {
  func.func @_qkv_proj_kernel(%arg0: i32, %arg1: i32, %arg2: memref<8x128xf32, #tpu.memory_space<vmem>>, %arg3: memref<128x384xf32, #tpu.memory_space<vmem>>, %arg4: memref<8x384xf32, #tpu.memory_space<vmem>>) attributes {dimension_semantics = [#tpu.dimension_semantics<parallel>, #tpu.dimension_semantics<parallel>], iteration_bounds = array<i64: 1, 1>, scalar_prefetch = 0 : i64, scratch_operands = 0 : i64, tpu.core_type = #tpu.core_type<tc>, window_params = [{transform_indices = @transform_0, window_bounds = array<i64: 8, 128>}, {transform_indices = @transform_1, window_bounds = array<i64: 128, 384>}, {transform_indices = @transform_2, window_bounds = array<i64: 8, 384>}]} {
    %c0 = arith.constant 0 : index
    %c0_0 = arith.constant 0 : index
    %0 = vector.load %arg2[%c0, %c0_0] : memref<8x128xf32, #tpu.memory_space<vmem>>, vector<8x128xf32>
    %c0_1 = arith.constant 0 : index
    %c0_2 = arith.constant 0 : index
    %1 = vector.load %arg3[%c0_1, %c0_2] : memref<128x384xf32, #tpu.memory_space<vmem>>, vector<128x384xf32>
    %cst = arith.constant dense<0.000000e+00> : vector<8x384xf32>
    %2 = tpu.matmul %0, %1, %cst {dimension_numbers = #tpu.dot_dimension_numbers<[1], [0], [0], [1], [0, 0, 1, 1], [], []>} : vector<8x128xf32>, vector<128x384xf32>, vector<8x384xf32> -> vector<8x384xf32>
    %c0_3 = arith.constant 0 : index
    %c0_4 = arith.constant 0 : index
    %3 = vector.load %arg4[%c0_3, %c0_4] : memref<8x384xf32, #tpu.memory_space<vmem>>, vector<8x384xf32>
    tpu.vector_store %arg4[%c0_3, %c0_4], %2 {strides = array<i32>} : memref<8x384xf32, #tpu.memory_space<vmem>>, vector<8x384xf32>,
    return
  }
  func.func @transform_0(%arg0: i32, %arg1: i32) -> (i32, i32) {
    %c0_i32 = arith.constant 0 : i32
    %c0_i32_0 = arith.constant 0 : i32
    return %arg1, %c0_i32 : i32, i32
  }
  func.func @transform_1(%arg0: i32, %arg1: i32) -> (i32, i32) {
    %c0_i32 = arith.constant 0 : i32
    %c0_i32_0 = arith.constant 0 : i32
    return %c0_i32, %arg0 : i32, i32
  }
  func.func @transform_2(%arg0: i32, %arg1: i32) -> (i32, i32) {
    %c0_i32 = arith.constant 0 : i32
    return %arg1, %arg0 : i32, i32
  }
}

</mosaic_0001>

<bundles_post_ra>
// kernel: tpu_custom_call.1
= control target key start
LH: loop header
LB: loop body
LE: loop exit
PB: predicated region body
PF: predicated region fallthrough
CT: control target
= control target key end

     0   :  { %7 = vsyncpa [#allocation3], 0  ;;  %s509_s0 = inlined_call_operand.hbm [shape: f32[8,128], index: 0, kind: input, shape index: {}]   ;;  %s510_s1 = inlined_call_operand.hbm [shape: f32[128,384], index: 1, kind: input, shape index: {}]   ;;  %s511_s2 = inlined_call_operand.hbm [shape: f32[8,384], index: 2, kind: output, shape index: {}]  }
   0x1   :  { %8 = vsyncpa [#allocation6], 0 }
   0x2   :  { %9 = vsyncpa [#allocation4], 0  ;;  %s435_s9 = smov [#allocation2]   ;;  %s436_s11 = smov [#allocation5]  }
   0x3   :  { %s16_s10 = sshll.u32 %s435_s9, 4  ;;  %s25_s12 = sshll.u32 %s436_s11, 4  ;;  %s17_s10 = int_to_ptr.vmem [resolvable:$true] %s16_s10  ;;  %s458_s12 = int_to_ptr.vmem [resolvable:$true] %s25_s12 }
   0x4   :  { %s363_s15 = scalar_lea.hbm %s509_s0, 128 }
   0x5   :  { %p364_p0 = scmp.ne.s32.totalorder %s509_s0, %s363_s15  ;;  %p367_p1 = scmp.lt.u32.totalorder %s363_s15, %s509_s0 }
   0x7   :  { %p369_p2 = pnand %p367_p1, %p364_p0 }
   0x9   :  { %372 = shalt.err (!%p369_p2)
}
   0xa   :  { %s373_s20 = scalar_lea.vmem %s17_s10, 128  ;;  %p378_p4 = scmp.lt.s32.totalorder %s17_s10, %s17_s10 }
   0xb   :  { %p374_p3 = scmp.ne.s32.totalorder %s17_s10, %s373_s20  ;;  %p379_p5 = scmp.lt.s32.totalorder %s373_s20, %s373_s20 }
   0xd   :  { %p380_p6 = por %p379_p5, %p378_p4 }
   0xf   :  { %p381_p7 = pnand %p380_p6, %p374_p3 }
  0x11   :  { %384 = shalt.err (!%p381_p7)
}
  0x12   :  { %19 = dma.hbm_to_vmem [thread:$0]  %s509_s0, 128, %s17_s10, [#allocation3]  }
  0x13   :  { %s385_s25 = scalar_lea.hbm %s510_s1, 6144 }
  0x14   :  { %p386_p8 = scmp.ne.s32.totalorder %s510_s1, %s385_s25  ;;  %p389_p9 = scmp.lt.u32.totalorder %s385_s25, %s510_s1 }
  0x16   :  { %p391_p10 = pnand %p389_p9, %p386_p8 }
  0x18   :  { %394 = shalt.err (!%p391_p10)
}
  0x19   :  { %s395_s30 = scalar_lea.vmem %s458_s12, 6144  ;;  %p400_p12 = scmp.lt.s32.totalorder %s458_s12, %s458_s12 }
  0x1a   :  { %p396_p11 = scmp.ne.s32.totalorder %s458_s12, %s395_s30  ;;  %p401_p13 = scmp.lt.s32.totalorder %s395_s30, %s395_s30 }
  0x1c   :  { %p402_p0 = por %p401_p13, %p400_p12 }
  0x1e   :  { %p403_p1 = pnand %p402_p0, %p396_p11 }
  0x20   :  { %406 = shalt.err (!%p403_p1)
}
  0x21   :  { %s437_s0 = smov 384   ;;  %s438_s3 = smov 24  }
  0x22   :  { %31 = dma.hbm_to_vmem [thread:$0]  %s510_s1, 6144, %s458_s12, [#allocation6], %s437_s0, %s437_s0, %s438_s3  }
  0x23   :  { %429 = dma.done.wait [#allocation3], 128  }
  0x24   :  { %430 = vsyncadd [#allocation3], 4294967168 }
  0x25   :  { %431 = dma.done.wait [#allocation6], 6144  }
  0x26   :  { %432 = vsyncadd [#allocation6], 4294961152  ;;  %v439_v0 = vmov 0.0|0.0   ;;  %v440_v1 = vmov 0.0   ;;  %vm441_vm0 = vmmov 0   ;;  %v40_v2 = vld [vmem:[#allocation5 + $0x8] sm:$0xff] }
  0x27   :  { %331 = vmatprep.subr.bf16.mxu1 %v439_v0  ;;  %151 = vmatprep.mubr.f32.mxu0 %v440_v1  ;;  %v43_v3 = vld [vmem:[#allocation5 + $0x20] sm:$0xff]  ;;  %v42_v6 = vld [vmem:[#allocation5 + $0x18] sm:$0xff]  ;;  %v41_v7 = vld [vmem:[#allocation5 + $0x10] sm:$0xff]  ;;  %s442_s1 = smov [#allocation7]  }
  0x28   :  { %296 = vmatprep.mubr.msk.f32.mxu1 %vm441_vm0, %v440_v1  ;;  %v39_v4 = vld [vmem:[#allocation5] sm:$0xff]  ;;  %v299_v5 = vpack.c.bf16 %v43_v3, %v40_v2  ;;  %v44_v8 = vld [vmem:[#allocation5 + $0x28] sm:$0xff]  ;;  %v46_v11 = vld [vmem:[#allocation5 + $0x38] sm:$0xff]  ;;  %s237_s6 = sshll.u32 %s442_s1, 4  ;;  %s238_s6 = int_to_ptr.vmem [resolvable:$true] %s237_s6 }
  0x29   :  { %v301_v9 = vpack.c.bf16 %v42_v6, %v39_v4  ;;  %v332_v10 = vpack.c.bf16 %v44_v8, %v41_v7  ;;  %v49_v12 = vld [vmem:[#allocation5 + $0x50] sm:$0xff]  ;;  %v48_v15 = vld [vmem:[#allocation5 + $0x48] sm:$0xff]  ;;  %v47_v16 = vld [vmem:[#allocation5 + $0x40] sm:$0xff]  ;;  %s407_s7 = scalar_lea.vmem %s238_s6, 384  ;;  %p412_p3 = scmp.lt.s32.totalorder %s238_s6, %s238_s6 }
  0x2a   :  { %v45_v13 = vld [vmem:[#allocation5 + $0x30] sm:$0xff]  ;;  %300 = vmatprep.subr.bf16.mxu0 %v299_v5  ;;  %v303_v14 = vpack.c.bf16 %v49_v12, %v46_v11  ;;  %v50_v17 = vld [vmem:[#allocation5 + $0x58] sm:$0xff]  ;;  %v52_v20 = vld [vmem:[#allocation5 + $0x68] sm:$0xff]  ;;  %p408_p2 = scmp.ne.s32.totalorder %s238_s6, %s407_s7  ;;  %p413_p4 = scmp.lt.s32.totalorder %s407_s7, %s407_s7 }
  0x2b   :  { %302 = vmatpush1.bf16.msra.mxu0 %v301_v9  ;;  %333 = vmatpush3.bf16.msra.mxu1 %v332_v10  ;;  %v305_v18 = vpack.c.bf16 %v48_v15, %v45_v13  ;;  %v335_v19 = vpack.c.bf16 %v50_v17, %v47_v16  ;;  %v55_v21 = vld [vmem:[#allocation5 + $0x80] sm:$0xff]  ;;  %v54_v24 = vld [vmem:[#allocation5 + $0x78] sm:$0xff]  ;;  %v53_v25 = vld [vmem:[#allocation5 + $0x70] sm:$0xff] }
  0x2c   :  { %v51_v22 = vld [vmem:[#allocation5 + $0x60] sm:$0xff]  ;;  %304 = vmatprep.subr.bf16.mxu0 %v303_v14  ;;  %334 = vmatprep.subr.bf16.mxu1 %v439_v0  ;;  %v307_v23 = vpack.c.bf16 %v55_v21, %v52_v20  ;;  %v56_v26 = vld [vmem:[#allocation5 + $0x88] sm:$0xff]  ;;  %v58_v27 = vld [vmem:[#allocation5 + $0x98] sm:$0xff]  ;;  %p414_p5 = por %p413_p4, %p412_p3 }
  0x2d   :  { %v61_v28 = vld [vmem:[#allocation5 + $0xb0] sm:$0xff]  ;;  %v309_v29 = vpack.c.bf16 %v54_v24, %v51_v22  ;;  %v338_v30 = vpack.c.bf16 %v56_v26, %v53_v25  ;;  %v60_v33 = vld [vmem:[#allocation5 + $0xa8] sm:$0xff]  ;;  %v59_v34 = vld [vmem:[#allocation5 + $0xa0] sm:$0xff] }
  0x2e   :  { %v57_v31 = vld [vmem:[#allocation5 + $0x90] sm:$0xff]  ;;  %v311_v32 = vpack.c.bf16 %v61_v28, %v58_v27  ;;  %v62_v35 = vld [vmem:[#allocation5 + $0xb8] sm:$0xff]  ;;  %v64_v36 = vld [vmem:[#allocation5 + $0xc8] sm:$0xff]  ;;  %p415_p6 = pnand %p414_p5, %p408_p2 }
  0x2f   :  { %306 = vmatpush1.bf16.msra.mxu0 %v305_v18  ;;  %336 = vmatpush3.bf16.msra.mxu1 %v335_v19  ;;  %v67_v37 = vld [vmem:[#allocation5 + $0xe0] sm:$0xff]  ;;  %v313_v38 = vpack.c.bf16 %v60_v33, %v57_v31  ;;  %v341_v39 = vpack.c.bf16 %v62_v35, %v59_v34  ;;  %v66_v42 = vld [vmem:[#allocation5 + $0xd8] sm:$0xff]  ;;  %v65_v43 = vld [vmem:[#allocation5 + $0xd0] sm:$0xff] }
  0x30   :  { %308 = vmatprep.subr.bf16.mxu0 %v307_v23  ;;  %337 = vmatprep.subr.bf16.mxu1 %v439_v0  ;;  %v63_v40 = vld [vmem:[#allocation5 + $0xc0] sm:$0xff]  ;;  %v315_v41 = vpack.c.bf16 %v67_v37, %v64_v36  ;;  %v68_v44 = vld [vmem:[#allocation5 + $0xe8] sm:$0xff]  ;;  %v70_v45 = vld [vmem:[#allocation5 + $0xf8] sm:$0xff] }
  0x31   :  { %v73_v46 = vld [vmem:[#allocation5 + $0x110] sm:$0xff]  ;;  %v317_v47 = vpack.c.bf16 %v66_v42, %v63_v40  ;;  %v344_v48 = vpack.c.bf16 %v68_v44, %v65_v43  ;;  %v72_v51 = vld [vmem:[#allocation5 + $0x108] sm:$0xff]  ;;  %v71_v52 = vld [vmem:[#allocation5 + $0x100] sm:$0xff] }
  0x32   :  { %v69_v49 = vld [vmem:[#allocation5 + $0xf0] sm:$0xff]  ;;  %v319_v50 = vpack.c.bf16 %v73_v46, %v70_v45  ;;  %v74_v53 = vld [vmem:[#allocation5 + $0x118] sm:$0xff]  ;;  %v76_v54 = vld [vmem:[#allocation5 + $0x128] sm:$0xff] }
  0x33   :  { %310 = vmatpush1.bf16.msra.mxu0 %v309_v29  ;;  %339 = vmatpush3.bf16.msra.mxu1 %v338_v30  ;;  %v79_v55 = vld [vmem:[#allocation5 + $0x140] sm:$0xff]  ;;  %v321_v56 = vpack.c.bf16 %v72_v51, %v69_v49  ;;  %v347_v57 = vpack.c.bf16 %v74_v53, %v71_v52  ;;  %v78_v60 = vld [vmem:[#allocation5 + $0x138] sm:$0xff]  ;;  %v77_v61 = vld [vmem:[#allocation5 + $0x130] sm:$0xff] }
  0x34   :  { %312 = vmatprep.subr.bf16.mxu0 %v311_v32  ;;  %340 = vmatprep.subr.bf16.mxu1 %v439_v0  ;;  %v75_v58 = vld [vmem:[#allocation5 + $0x120] sm:$0xff]  ;;  %v323_v59 = vpack.c.bf16 %v79_v55, %v76_v54  ;;  %v80_v62 = vld [vmem:[#allocation5 + $0x148] sm:$0xff]  ;;  %v82_v63 = vld [vmem:[#allocation5 + $0x158] sm:$0xff] }
  0x35   :  { %v85_v1 = vld [vmem:[#allocation5 + $0x170] sm:$0xff]  ;;  %v325_v2 = vpack.c.bf16 %v78_v60, %v75_v58  ;;  %v350_v3 = vpack.c.bf16 %v80_v62, %v77_v61  ;;  %v84_v6 = vld [vmem:[#allocation5 + $0x168] sm:$0xff]  ;;  %v83_v7 = vld [vmem:[#allocation5 + $0x160] sm:$0xff] }
  0x36   :  { %v81_v4 = vld [vmem:[#allocation5 + $0x150] sm:$0xff]  ;;  %v327_v5 = vpack.c.bf16 %v85_v1, %v82_v63  ;;  %v86_v8 = vld [vmem:[#allocation5 + $0x178] sm:$0xff] }
  0x37   :  { %314 = vmatpush1.bf16.msra.mxu0 %v313_v38  ;;  %342 = vmatpush3.bf16.msra.mxu1 %v341_v39  ;;  %v329_v9 = vpack.c.bf16 %v84_v6, %v81_v4  ;;  %v353_v10 = vpack.c.bf16 %v86_v8, %v83_v7  ;;  %v38_v11 = vld [vmem:[#allocation2] sm:$0xff] }
  0x38   :  { %316 = vmatprep.subr.bf16.mxu0 %v315_v41  ;;  %343 = vmatprep.subr.bf16.mxu1 %v439_v0 }
  0x3b   :  { %318 = vmatpush1.bf16.msra.mxu0 %v317_v47  ;;  %345 = vmatpush3.bf16.msra.mxu1 %v344_v48 }
  0x3c   :  { %320 = vmatprep.subr.bf16.mxu0 %v319_v50  ;;  %346 = vmatprep.subr.bf16.mxu1 %v439_v0 }
  0x3f   :  { %322 = vmatpush1.bf16.msra.mxu0 %v321_v56  ;;  %348 = vmatpush3.bf16.msra.mxu1 %v347_v57 }
  0x40   :  { %324 = vmatprep.subr.bf16.mxu0 %v323_v59  ;;  %349 = vmatprep.subr.bf16.mxu1 %v439_v0 }
  0x43   :  { %326 = vmatpush1.bf16.msra.mxu0 %v325_v2  ;;  %351 = vmatpush3.bf16.msra.mxu1 %v350_v3 }
  0x44   :  { %328 = vmatprep.subr.bf16.mxu0 %v327_v5  ;;  %352 = vmatprep.subr.bf16.mxu1 %v439_v0 }
  0x47   :  { %330 = vmatpush1.bf16.msra.mxu0 %v329_v9  ;;  %354 = vmatpush3.bf16.msra.mxu1 %v353_v10 }
  0x4a   :  { %152 = vmatmul.mubr.f32.vlgmr.msra.gmra.mrb[0].mxu0 %v38_v11  ;;  %297 = vmatmul.mubr.f32.vlgmr.msra.gmra.mrb[0].mxu1 %v38_v11 }
 0x11d   :  { %v153_v12 = vpop.f32.mrb[0].mxu0  ;;  %v224_v13 = vpop.f32.mrb[0].mxu1 }
 0x11e   :  { %228 = vst [vmem:[#allocation7] sm:$0xff] %v153_v12  ;;  %230 = vst [vmem:[#allocation7 + $0x10] sm:$0xff] %v224_v13  ;;  %v155_v14 = vpop.f32.mrb[1].mxu0  ;;  %v298_v15 = vpop.f32.mrb[1].mxu1 }
 0x11f   :  { %229 = vst [vmem:[#allocation7 + $0x8] sm:$0xff] %v155_v14 }
 0x120   :  { %418 = shalt.err (!%p415_p6)
}
 0x121   :  { %s419_s10 = scalar_lea.hbm %s511_s2, 384 }
 0x122   :  { %p420_p7 = scmp.ne.s32.totalorder %s511_s2, %s419_s10  ;;  %p423_p8 = scmp.lt.u32.totalorder %s419_s10, %s511_s2 }
 0x124   :  { %p425_p9 = pnand %p423_p8, %p420_p7 }
 0x126   :  { %428 = shalt.err (!%p425_p9)
}
 0x127   :  { %240 = dma.vmem_to_hbm [thread:$0]  %s238_s6, 384, %s511_s2, [#allocation4]  }
 0x128   :  { %433 = dma.done.wait [#allocation4], 384  }
 0x129   :  { %434 = vsyncadd [#allocation4], 4294966912 }
 0x12a   :  { %244 = vsyncpa [#allocation3], 1 }
 0x12b   :  { %245 = vsyncpa [#allocation6], 1 }
 0x12c   :  { %246 = vsyncpa [#allocation4], 1 }

</bundles_post_ra>
